<compile_context>
chip_gen: v7x
topology: tpu7x:2x2x1
jax: 0.10.0
libtpu: 0.0.40
codegen_flags: <defaults>
</compile_context>

<pallas_src>
import functools

import jax
import jax.numpy as jnp
from jax.experimental import pallas as pl
from jax.experimental.pallas import tpu as pltpu


def _mlp_kernel(xT_ref, w1_ref, b1_ref, w2_ref, b2_ref, o_ref):
    # Hidden layer: (H, F) @ (F, TB) + (H, 1) -> ReLU, fused in VMEM.
    h = jnp.dot(w1_ref[...], xT_ref[...], preferred_element_type=jnp.float32)
    h = jnp.maximum(h + b1_ref[...], 0.0)
    # Output layer: (O, H) @ (H, TB) + (O, 1).
    y = jnp.dot(w2_ref[...], h, preferred_element_type=jnp.float32) + b2_ref[...]
    o_ref[...] = y.astype(o_ref.dtype)


def _tile_cap_for_device():
    """Generation-specific batch-tile cap (multiple of 128).

    v5e: ~16 MiB scoped-VMEM default -> tb<=32768 (~9 MB live).
    v6e / v7x: ~32 MiB scoped default -> tb<=65536 (~16 MB live); also safely
    under v7x's 64 MiB physical VMEM per TensorCore.
    """
    try:
        kind = jax.devices()[0].device_kind.lower()
    except Exception:  # pragma: no cover - be conservative if query fails
        return 32768
    if "v6" in kind or "v7" in kind or "7x" in kind or "trillium" in kind:
        return 65536
    return 32768


def _choose_tile(batch, cap):
    """Pick a batch tile: full extent for tiny batches, otherwise a multiple
    of 128, capped, and small enough that the grid has >=2 tiles (so the
    'parallel' batch axis actually feeds both TensorCores on v7x)."""
    if batch <= 128:
        return batch
    b128 = pl.cdiv(batch, 128) * 128
    half = (b128 // 2) // 128 * 128
    tb = half if half >= 128 else b128
    return min(cap, tb)


def net_forward_t(xT, w1, b1, w2, b2, *, tb=None):
    """Forward pass of Net in the lane-dense (transposed) layout.

    xT : (F, B) float32   -- batch on the 128-lane axis
    w1 : (H, F), b1: (H,) -- hidden  Linear (PyTorch (out, in) layout)
    w2 : (O, H), b2: (O,) -- predict Linear (PyTorch (out, in) layout)
    returns yT : (O, B) float32
    """
    F, B = xT.shape
    H = w1.shape[0]
    O = w2.shape[0]

    if tb is None:
        tb = _choose_tile(B, _tile_cap_for_device())
    num_tiles = pl.cdiv(B, tb)

    b1c = b1.reshape(H, 1)
    b2c = b2.reshape(O, 1)

    cost = pl.CostEstimate(
        flops=2 * B * (H * F + O * H),
        transcendentals=0,
        bytes_accessed=4 * (B * F + B * O + H * F + H + O * H + O),
    )

    yT = pl.pallas_call(
        _mlp_kernel,
        out_shape=jax.ShapeDtypeStruct((O, B), jnp.float32),
        grid=(num_tiles,),
        in_specs=[
            # Activations stream over the batch grid axis (lane-dense tiles);
            # the ragged last block (B % tb != 0) is masked by Pallas.
            pl.BlockSpec((F, tb), lambda i: (0, i)),
            # Tiny weights/biases stay resident in VMEM across all tiles.
            pl.BlockSpec((H, F), lambda i: (0, 0)),
            pl.BlockSpec((H, 1), lambda i: (0, 0)),
            pl.BlockSpec((O, H), lambda i: (0, 0)),
            pl.BlockSpec((O, 1), lambda i: (0, 0)),
        ],
        out_specs=pl.BlockSpec((O, tb), lambda i: (0, i)),
        compiler_params=pltpu.CompilerParams(
            dimension_semantics=("parallel",),  # shard batch tiles across TCs (v7x)
        ),
        cost_estimate=cost,
    )(xT, w1, b1c, w2, b2c)

    return yT


@functools.partial(jax.jit, static_argnames=("tb",))
def net_forward(x, w1, b1, w2, b2, tb=None):
    """PyTorch-interface forward pass.

    x : (B, F) float32  ->  returns (B, O) float32.
    The two layout transposes are the only wrapper traffic; they fuse with
    neighbouring ops under jit.  Use net_forward_t to avoid them entirely.
    """
    yT = net_forward_t(jnp.transpose(x), w1, b1, w2, b2, tb=tb)
    return jnp.transpose(yT)


def _ref_forward(x, w1, b1, w2, b2):
    h = jnp.maximum(x @ w1.T + b1, 0.0)
    return h @ w2.T + b2


if __name__ == "__main__":
    # Module hyperparameters (small, consistent with the Linear layers).
    n_feature, n_hidden, n_output = 4, 32, 2
    batch = 8

    key = jax.random.PRNGKey(0)
    kx, kw1, kb1, kw2, kb2 = jax.random.split(key, 5)

    # Deterministic parameter init (PyTorch default-style uniform bounds),
    # weights in PyTorch Linear (out, in) layout.
    bound1 = 1.0 / (n_feature ** 0.5)
    bound2 = 1.0 / (n_hidden ** 0.5)
    x = jax.random.normal(kx, (batch, n_feature), dtype=jnp.float32)
    w1 = jax.random.uniform(kw1, (n_hidden, n_feature), jnp.float32, -bound1, bound1)
    b1 = jax.random.uniform(kb1, (n_hidden,), jnp.float32, -bound1, bound1)
    w2 = jax.random.uniform(kw2, (n_output, n_hidden), jnp.float32, -bound2, bound2)
    b2 = jax.random.uniform(kb2, (n_output,), jnp.float32, -bound2, bound2)

    out = net_forward(x, w1, b1, w2, b2)
    jax.block_until_ready(out)

    ref = _ref_forward(x, w1, b1, w2, b2)
    assert out.shape == (batch, n_output)
    assert jnp.allclose(out, ref, atol=1e-5, rtol=1e-5)

    # Also exercise a ragged multi-tile grid (B not a multiple of the tile)
    # to confirm the no-pad / masked-edge path is correct.
    x2 = jax.random.normal(kx, (300, n_feature), dtype=jnp.float32)
    out2 = net_forward(x2, w1, b1, w2, b2, tb=128)
    jax.block_until_ready(out2)
    assert jnp.allclose(out2, _ref_forward(x2, w1, b1, w2, b2), atol=1e-5, rtol=1e-5)

    print("KERNEL_OK")
</pallas_src>

<mosaic_0001>
module attributes {stable_mosaic.version = 11 : i64} {
  func.func @_mlp_kernel(%arg0: i32, %arg1: memref<4x8xf32, #tpu.memory_space<vmem>>, %arg2: memref<32x4xf32, #tpu.memory_space<vmem>>, %arg3: memref<32x1xf32, #tpu.memory_space<vmem>>, %arg4: memref<2x32xf32, #tpu.memory_space<vmem>>, %arg5: memref<2x1xf32, #tpu.memory_space<vmem>>, %arg6: memref<2x8xf32, #tpu.memory_space<vmem>>) attributes {dimension_semantics = [#tpu.dimension_semantics<parallel>], iteration_bounds = array<i64: 1>, scalar_prefetch = 0 : i64, scratch_operands = 0 : i64, tpu.core_type = #tpu.core_type<tc>, window_params = [{transform_indices = @transform_0, window_bounds = array<i64: 4, 8>}, {pipeline_mode = #tpu.pipeline_mode<synchronous>, transform_indices = @transform_1, window_bounds = array<i64: 32, 4>}, {pipeline_mode = #tpu.pipeline_mode<synchronous>, transform_indices = @transform_2, window_bounds = array<i64: 32, 1>}, {pipeline_mode = #tpu.pipeline_mode<synchronous>, transform_indices = @transform_3, window_bounds = array<i64: 2, 32>}, {pipeline_mode = #tpu.pipeline_mode<synchronous>, transform_indices = @transform_4, window_bounds = array<i64: 2, 1>}, {transform_indices = @transform_5, window_bounds = array<i64: 2, 8>}]} {
    %c0 = arith.constant 0 : index
    %c0_0 = arith.constant 0 : index
    %0 = vector.load %arg2[%c0, %c0_0] : memref<32x4xf32, #tpu.memory_space<vmem>>, vector<32x4xf32>
    %c0_1 = arith.constant 0 : index
    %c0_2 = arith.constant 0 : index
    %1 = vector.load %arg1[%c0_1, %c0_2] : memref<4x8xf32, #tpu.memory_space<vmem>>, vector<4x8xf32>
    %cst = arith.constant dense<0.000000e+00> : vector<32x8xf32>
    %2 = tpu.matmul %0, %1, %cst {dimension_numbers = #tpu.dot_dimension_numbers<[1], [0], [0], [1], [0, 0, 1, 1], [], []>} : vector<32x4xf32>, vector<4x8xf32>, vector<32x8xf32> -> vector<32x8xf32>
    %c0_3 = arith.constant 0 : index
    %c0_4 = arith.constant 0 : index
    %3 = vector.load %arg3[%c0_3, %c0_4] : memref<32x1xf32, #tpu.memory_space<vmem>>, vector<32x1xf32>
    %4 = vector.broadcast %3 : vector<32x1xf32> to vector<32x8xf32>
    %5 = arith.addf %2, %4 : vector<32x8xf32>
    %cst_5 = arith.constant 0.000000e+00 : f32
    %6 = vector.broadcast %cst_5 : f32 to vector<32x8xf32>
    %7 = arith.maximumf %5, %6 : vector<32x8xf32>
    %c0_6 = arith.constant 0 : index
    %c0_7 = arith.constant 0 : index
    %8 = vector.load %arg4[%c0_6, %c0_7] : memref<2x32xf32, #tpu.memory_space<vmem>>, vector<2x32xf32>
    %cst_8 = arith.constant dense<0.000000e+00> : vector<2x8xf32>
    %9 = tpu.matmul %8, %7, %cst_8 {dimension_numbers = #tpu.dot_dimension_numbers<[1], [0], [0], [1], [0, 0, 1, 1], [], []>} : vector<2x32xf32>, vector<32x8xf32>, vector<2x8xf32> -> vector<2x8xf32>
    %c0_9 = arith.constant 0 : index
    %c0_10 = arith.constant 0 : index
    %10 = vector.load %arg5[%c0_9, %c0_10] : memref<2x1xf32, #tpu.memory_space<vmem>>, vector<2x1xf32>
    %11 = vector.broadcast %10 : vector<2x1xf32> to vector<2x8xf32>
    %12 = arith.addf %9, %11 : vector<2x8xf32>
    %c0_11 = arith.constant 0 : index
    %c0_12 = arith.constant 0 : index
    %13 = vector.load %arg6[%c0_11, %c0_12] : memref<2x8xf32, #tpu.memory_space<vmem>>, vector<2x8xf32>
    tpu.vector_store %arg6[%c0_11, %c0_12], %12 {strides = array<i32>} : memref<2x8xf32, #tpu.memory_space<vmem>>, vector<2x8xf32>,
    return
  }
  func.func @transform_0(%arg0: i32) -> (i32, i32) {
    %c0_i32 = arith.constant 0 : i32
    %c0_i32_0 = arith.constant 0 : i32
    return %c0_i32, %arg0 : i32, i32
  }
  func.func @transform_1(%arg0: i32) -> (i32, i32) {
    %c0_i32 = arith.constant 0 : i32
    %c0_i32_0 = arith.constant 0 : i32
    %c0_i32_1 = arith.constant 0 : i32
    return %c0_i32, %c0_i32_0 : i32, i32
  }
  func.func @transform_2(%arg0: i32) -> (i32, i32) {
    %c0_i32 = arith.constant 0 : i32
    %c0_i32_0 = arith.constant 0 : i32
    %c0_i32_1 = arith.constant 0 : i32
    return %c0_i32, %c0_i32_0 : i32, i32
  }
  func.func @transform_3(%arg0: i32) -> (i32, i32) {
    %c0_i32 = arith.constant 0 : i32
    %c0_i32_0 = arith.constant 0 : i32
    %c0_i32_1 = arith.constant 0 : i32
    return %c0_i32, %c0_i32_0 : i32, i32
  }
  func.func @transform_4(%arg0: i32) -> (i32, i32) {
    %c0_i32 = arith.constant 0 : i32
    %c0_i32_0 = arith.constant 0 : i32
    %c0_i32_1 = arith.constant 0 : i32
    return %c0_i32, %c0_i32_0 : i32, i32
  }
  func.func @transform_5(%arg0: i32) -> (i32, i32) {
    %c0_i32 = arith.constant 0 : i32
    %c0_i32_0 = arith.constant 0 : i32
    return %c0_i32, %arg0 : i32, i32
  }
}

</mosaic_0001>

<bundles_post_ra>
// kernel: net_forward.1
= control target key start
LH: loop header
LB: loop body
LE: loop exit
PB: predicated region body
PF: predicated region fallthrough
CT: control target
= control target key end

     0   :  { %vm63_vm0 = vcmask 1043456   ;;  %vm50_vm1 = vcmask 31744   ;;  %v325_v5 = vmov 0   ;;  %s409_s0 = inlined_call_operand.vmem [shape: f32[4,8], index: 0, kind: input, shape index: {}]   ;;  %s410_s1 = inlined_call_operand.vmem [shape: f32[32,4], index: 1, kind: input, shape index: {}]   ;;  %s411_s2 = inlined_call_operand.vmem [shape: f32[32,1], index: 2, kind: input, shape index: {}]   ;;  %s412_s3 = inlined_call_operand.vmem [shape: f32[2,32], index: 3, kind: input, shape index: {}]   ;;  %s413_s4 = inlined_call_operand.vmem [shape: f32[2,1], index: 4, kind: input, shape index: {}]   ;;  %s414_s5 = inlined_call_operand.hbm [shape: f32[2,8], index: 5, kind: output, shape index: {}]  }
   0x1   :  { %v25_v0 = vld [vmem:[%s409_s0] sm:$0xf]  ;;  %v22_v2 = vld [vmem:[%s410_s1 + $0x8] sm:$0xff]  ;;  %v23_v3 = vld [vmem:[%s410_s1 + $0x10] sm:$0xff]  ;;  %299 = vset.pattern.permute.xlu0 %v325_v5 }
   0x2   :  { %v21_v1 = vld [vmem:[%s410_s1] sm:$0xff]  ;;  %269 = vmatprep.subr.msk.mxu0 %vm63_vm0, %v25_v0  ;;  %v28_v6 = vld [vmem:[%s411_s2 + $0x10] sm:$0xff] }
   0x3   :  { %271 = vmatprep.mubr.msk.f32.mxu0 %vm50_vm1, %v21_v1  ;;  %v26_v4 = vld [vmem:[%s411_s2] sm:$0xff]  ;;  %270 = vmatpush3.msk.msra.mxu0 %vm63_vm0, %v25_v0 }
   0x4   :  { %272 = vmatmul.mubr.msk.f32.vlgmr.msra.gmra.mrb[0].mxu0 %vm50_vm1, %v22_v2  ;;  %32 = vperm.xlu0 %299, %v26_v4  }
   0x5   :  { %10 = vsyncpa [#allocation3], 0  ;;  %274 = vmatprep.mubr.msk.f32.mxu0 %vm50_vm1, %v23_v3  ;;  %v24_v7 = vld [vmem:[%s410_s1 + $0x18] sm:$0xff]  ;;  %v27_v8 = vld [vmem:[%s411_s2 + $0x8] sm:$0xff]  ;;  %300 = vset.pattern.permute.xlu1 %v325_v5  ;;  %v326_v11 = vmov 0.0|0.0   ;;  %vm327_vm2 = vmmov 0  }
   0x6   :  { %42 = vperm.xlu1 %300, %v28_v6   ;;  %v29_v9 = vld [vmem:[%s411_s2 + $0x18] sm:$0xff]  ;;  %v157_v10 = vld [vmem:[%s413_s4] sm:$0x3]  ;;  %288 = vmatprep.subr.bf16.mxu1 %v326_v11  ;;  %v328_v12 = vmov 0.0   ;;  %vm163_vm3 = vcmask 261120   ;;  %s329_s4 = smov [#allocation2]  }
   0x7   :  { %285 = vmatprep.mubr.msk.f32.mxu1 %vm327_vm2, %v328_v12  ;;  %v156_v31 = vld [vmem:[%s412_s3] sm:$0x3]  ;;  %s245_s12 = sshll.u32 %s329_s4, 4  ;;  %vm237_vm4 = vcmask 58368   ;;  %s246_s12 = int_to_ptr.vmem [resolvable:$true] %s245_s12 }
   0x8   :  { %275 = vmatmul.mubr.msk.f32.gmra.mrb[2].mxu0 %vm50_vm1, %v24_v7  ;;  %37 = vperm.xlu0 %299, %v27_v8   ;;  %s301_s13 = scalar_lea.vmem %s246_s12, 32  ;;  %p306_p1 = scmp.lt.s32.totalorder %s246_s12, %s246_s12 }
   0x9   :  { %p302_p0 = scmp.ne.s32.totalorder %s246_s12, %s301_s13  ;;  %p307_p2 = scmp.lt.s32.totalorder %s301_s13, %s301_s13 }
   0xa   :  { %47 = vperm.xlu1 %300, %v29_v9  }
   0xb   :  { %p308_p3 = por %p307_p2, %p306_p1 }
   0xc   :  { %160 = vperm.xlu0 %299, %v157_v10  }
   0xd   :  { %p309_p4 = pnand %p308_p3, %p302_p0 }
  0x83   :  { %v33_v13 = vpop.permute.xlu0 %32 }
  0x85   :  { %v43_v14 = vpop.permute.xlu1 %42 }
  0x87   :  { %v38_v15 = vpop.permute.xlu0 %37 }
  0x89   :  { %v48_v21 = vpop.permute.xlu1 %47 }
  0x8b   :  { %v161_v32 = vpop.permute.xlu0 %160 }
  0xd7   :  { %v273_v16 = vpop.f32.mrb[0].mxu0 }
  0xd8   :  { %v139_v17 = vadd.f32 %v273_v16, %v38_v15  ;;  %v133_v18 = vpop.f32.mrb[1].mxu0 }
  0xd9   :  { %v134_v19 = vadd.f32 %v133_v18, %v33_v13 }
  0xda   :  { %v153_v20 = vmax.f32 %v139_v17, 0.0 }
  0xdb   :  { %v152_v22 = vmax.f32 %v134_v19, 0.0  ;;  %v276_v23 = vpop.f32.mrb[2].mxu0 }
  0xdc   :  { %v149_v24 = vadd.f32 %v276_v23, %v48_v21  ;;  %v143_v25 = vpop.f32.mrb[3].mxu0 }
  0xdd   :  { %v144_v26 = vadd.f32 %v143_v25, %v43_v14  ;;  %v289_v27 = vpack.c.bf16 %v153_v20, %v152_v22 }
  0xde   :  { %v155_v28 = vmax.f32 %v149_v24, 0.0 }
  0xdf   :  { %v154_v29 = vmax.f32 %v144_v26, 0.0  ;;  %290 = vmatpush3.bf16.msra.mxu1 %v289_v27 }
  0xe0   :  { %291 = vmatprep.subr.bf16.mxu1 %v326_v11 }
  0xe1   :  { %v292_v30 = vpack.c.bf16 %v155_v28, %v154_v29 }
  0xe3   :  { %293 = vmatpush3.bf16.msra.mxu1 %v292_v30 }
  0xe6   :  { %286 = vmatmul.mubr.msk.f32.vlgmr.msra.gmra.mrb[0].mxu1 %vm163_vm3, %v156_v31 }
 0x1b9   :  { %v233_v33 = vpop.f32.mrb[0].mxu1 }
 0x1ba   :  { %v234_v34 = vadd.f32 %v233_v33, %v161_v32  ;;  %v287_v35 = vpop.f32.mrb[1].mxu1 }
 0x1bc   :  { %238 = vst.msk [vmem:[#allocation2] sm:$0x3] %vm237_vm4, %v234_v34 }
 0x1bd   :  { %312 = shalt.err (!%p309_p4)
}
 0x1be   :  { %s313_s15 = scalar_lea.hbm %s414_s5, 32 }
 0x1bf   :  { %p314_p5 = scmp.ne.s32.totalorder %s414_s5, %s313_s15  ;;  %p317_p6 = scmp.lt.u32.totalorder %s313_s15, %s414_s5 }
 0x1c1   :  { %p319_p7 = pnand %p317_p6, %p314_p5 }
 0x1c3   :  { %322 = shalt.err (!%p319_p7)
}
 0x1c4   :  { %248 = dma.vmem_to_hbm [thread:$0]  %s246_s12, 32, %s414_s5, [#allocation3]  }
 0x1c5   :  { %323 = dma.done.wait [#allocation3], 32  }
 0x1c6   :  { %324 = vsyncadd [#allocation3], 4294967264 }
 0x1c7   :  { %252 = vsyncpa [#allocation3], 1 }

</bundles_post_ra>
